<compile_context>
chip_gen: v7x
topology: tpu7x:2x2x1
jax: 0.10.0
libtpu: 0.0.40
codegen_flags: <defaults>
</compile_context>

<pallas_src>
import jax
import jax.numpy as jnp
from jax.experimental import pallas as pl
from jax.experimental.pallas import tpu as pltpu

EPS = 1e-5
MOMENTUM = 0.1

_LANE = 128
_SUBLANE = 8
_DEFAULT_BLOCK_BYTES = 2 * 1024 * 1024   # target per-block bytes (native dtype)
_VMEM_LIMIT = 32 * 1024 * 1024           # scoped-VMEM limit, safe on v5e/v6e/v7x
_FUSED_MAX_VMEM = 24 * 1024 * 1024       # budget for the single-pass fused path


# --------------------------------------------------------------------------
# Tiling choice
# --------------------------------------------------------------------------
def _divisors(n):
    return [d for d in range(1, n + 1) if n % d == 0]


def _choose_tiling(N, C, HW, itemsize, block_bytes):
    """Pick a block (nb, cb, t) with nb|N, cb|C, t|HW, sized ~block_bytes."""
    # Lane tile candidates: multiples of 128 dividing HW (lane-dense, unmasked
    # stores).  Fall back to the full extent when HW % 128 != 0 (masked but
    # correct; block size then bounded via channel tiling below).
    t_cands = [t for t in range(_LANE, HW + 1, _LANE) if HW % t == 0]
    if not t_cands:
        t_cands = [HW]
    t_min = min(t_cands)

    # Channel tile: full C unless even the smallest lane tile blows the
    # budget; then the largest multiple-of-8 divisor of C that fits.
    cb = C
    if C * t_min * itemsize > block_bytes:
        c_cands = [c for c in range(_SUBLANE, C, _SUBLANE)
                   if C % c == 0 and c * t_min * itemsize <= block_bytes]
        if c_cands:
            cb = max(c_cands)

    # Lane tile: largest candidate fitting the budget with cb channels.
    t_fit = [t for t in t_cands if cb * t * itemsize <= block_bytes]
    t = max(t_fit) if t_fit else t_min

    # Batch tile: fatten small blocks (small C*HW) toward the budget.
    nb = 1
    for d in _divisors(N):
        if d * cb * t * itemsize <= block_bytes:
            nb = d
    return nb, cb, t


# --------------------------------------------------------------------------
# Kernels
# --------------------------------------------------------------------------
def _make_stats_kernel(nb, lanes, n_chunks):
    """Per-channel sum / sum-of-squares with lane-wide f32 accumulators."""

    def kernel(x_ref, sum_ref, sq_ref):
        # The accumulator block is revisited only along the (innermost,
        # "arbitrary") HW grid axis; init on its first step.
        @pl.when(pl.program_id(2) == 0)
        def _init():
            sum_ref[...] = jnp.zeros_like(sum_ref)
            sq_ref[...] = jnp.zeros_like(sq_ref)

        if n_chunks == 1:
            x = x_ref[...].astype(jnp.float32)              # (nb, cb, t)
            if lanes == x.shape[-1]:
                ps, pq = x, x * x                           # already lane-wide
            else:
                # Unaligned lane extent: plain cross-lane reduce (width-1 acc).
                ps = jnp.sum(x, axis=2, keepdims=True)
                pq = jnp.sum(x * x, axis=2, keepdims=True)
        else:
            # Lane-aligned: fold t lanes down to 128 with pure VALU adds
            # (tile-aligned static slices; no per-step XLU reduce).
            x0 = x_ref[:, :, 0:lanes].astype(jnp.float32)
            ps, pq = x0, x0 * x0
            for k in range(1, n_chunks):
                xk = x_ref[:, :, k * lanes:(k + 1) * lanes].astype(jnp.float32)
                ps = ps + xk
                pq = pq + xk * xk

        if nb > 1:
            ps = jnp.sum(ps, axis=0, keepdims=True)
            pq = jnp.sum(pq, axis=0, keepdims=True)
        sum_ref[...] += ps
        sq_ref[...] += pq

    return kernel


def _normalize_kernel(x_ref, scale_ref, shift_ref, o_ref):
    """y = x * scale + shift with per-channel scale/shift (2 VALU ops/elem)."""
    y = x_ref[...].astype(jnp.float32) * scale_ref[...] + shift_ref[...]
    o_ref[...] = y.astype(o_ref.dtype)


def _fused_kernel(x_ref, w_ref, b_ref, y_ref, mean_ref, var_ref):
    """Single-pass BN for VMEM-resident x: stats + normalize from one read."""
    x = x_ref[...].astype(jnp.float32)                      # (N, C, HW)
    inv_l = 1.0 / (x.shape[0] * x.shape[2])
    s = jnp.sum(x, axis=2, keepdims=True)                   # (N, C, 1)
    q = jnp.sum(x * x, axis=2, keepdims=True)               # (N, C, 1)
    s = jnp.sum(s, axis=0, keepdims=True)                   # (1, C, 1)
    q = jnp.sum(q, axis=0, keepdims=True)                   # (1, C, 1)
    mean = s * inv_l
    var = jnp.maximum(q * inv_l - mean * mean, 0.0)         # biased variance
    scale = w_ref[...] * jax.lax.rsqrt(var + EPS)
    shift = b_ref[...] - mean * scale
    y_ref[...] = (x * scale + shift).astype(y_ref.dtype)
    mean_ref[...] = mean
    var_ref[...] = var


# --------------------------------------------------------------------------
# Wrappers
# --------------------------------------------------------------------------
def _fused_forward(x3, w3, b3):
    N, C, HW = x3.shape
    full = lambda i: (0, 0, 0)
    y3, mean, var = pl.pallas_call(
        _fused_kernel,
        grid=(1,),
        in_specs=[
            pl.BlockSpec((N, C, HW), full),
            pl.BlockSpec((1, C, 1), full),
            pl.BlockSpec((1, C, 1), full),
        ],
        out_specs=(
            pl.BlockSpec((N, C, HW), full),
            pl.BlockSpec((1, C, 1), full),
            pl.BlockSpec((1, C, 1), full),
        ),
        out_shape=(
            jax.ShapeDtypeStruct((N, C, HW), x3.dtype),
            jax.ShapeDtypeStruct((1, C, 1), jnp.float32),
            jax.ShapeDtypeStruct((1, C, 1), jnp.float32),
        ),
        compiler_params=pltpu.CompilerParams(vmem_limit_bytes=_VMEM_LIMIT),
    )(x3, w3, b3)
    return y3, mean, var


def _two_pass_forward(x3, w3, b3, itemsize, block_bytes):
    N, C, HW = x3.shape
    L = N * HW
    nb, cb, t = _choose_tiling(N, C, HW, itemsize, block_bytes)
    if t % _LANE == 0:
        lanes, n_chunks = _LANE, t // _LANE
    else:
        lanes, n_chunks = 1, 1
    grid = (N // nb, C // cb, HW // t)

    # Explicit scoped-VMEM budget: x/y blocks are double-buffered plus some
    # f32 temporaries.  32 MiB is safe on all generations; only raise it for
    # shapes where no small block exists.
    blk = nb * cb * t * itemsize
    vmem_limit = max(_VMEM_LIMIT, min(100 * 1024 * 1024, 6 * blk + (4 << 20)))

    # ---- Pass 1: per-(batch-block, channel-block) partial sums (f32). ----
    # N and C grid axes are "parallel" (disjoint accumulator blocks -> v7x can
    # shard across both TensorCores); only the HW axis is "arbitrary".
    psum, psq = pl.pallas_call(
        _make_stats_kernel(nb, lanes, n_chunks),
        grid=grid,
        in_specs=[pl.BlockSpec((nb, cb, t), lambda n, c, j: (n, c, j))],
        out_specs=(
            pl.BlockSpec((1, cb, lanes), lambda n, c, j: (n, c, 0)),
            pl.BlockSpec((1, cb, lanes), lambda n, c, j: (n, c, 0)),
        ),
        out_shape=(
            jax.ShapeDtypeStruct((N // nb, C, lanes), jnp.float32),
            jax.ShapeDtypeStruct((N // nb, C, lanes), jnp.float32),
        ),
        compiler_params=pltpu.CompilerParams(
            dimension_semantics=("parallel", "parallel", "arbitrary"),
            vmem_limit_bytes=vmem_limit),
    )(x3)

    # ---- Tiny per-channel finalization (plain JAX glue). ----
    mean = (jnp.sum(psum, axis=(0, 2)) / L).reshape(1, C, 1)
    msq = (jnp.sum(psq, axis=(0, 2)) / L).reshape(1, C, 1)
    var = jnp.maximum(msq - mean * mean, 0.0)               # biased variance
    inv_std = jax.lax.rsqrt(var + EPS)
    scale = w3 * inv_std
    shift = b3 - mean * scale

    # ---- Pass 2: elementwise normalize, fully parallel grid. ----
    y3 = pl.pallas_call(
        _normalize_kernel,
        grid=grid,
        in_specs=[
            pl.BlockSpec((nb, cb, t), lambda n, c, j: (n, c, j)),
            pl.BlockSpec((1, cb, 1), lambda n, c, j: (0, c, 0)),
            pl.BlockSpec((1, cb, 1), lambda n, c, j: (0, c, 0)),
        ],
        out_specs=pl.BlockSpec((nb, cb, t), lambda n, c, j: (n, c, j)),
        out_shape=jax.ShapeDtypeStruct((N, C, HW), x3.dtype),
        compiler_params=pltpu.CompilerParams(
            dimension_semantics=("parallel", "parallel", "parallel"),
            vmem_limit_bytes=vmem_limit),
    )(x3, scale, shift)
    return y3, mean, var


def batchnorm2d_forward(x, weight, bias, running_mean, running_var,
                        *, block_bytes=_DEFAULT_BLOCK_BYTES,
                        force_two_pass=False):
    """Training-mode BatchNorm2d forward matching the reference module.

    x: (N, C, H, W); weight/bias/running_*: (1, C, 1, 1).
    Returns (y, new_running_mean, new_running_var).
    """
    N, C, H, W = x.shape
    HW = H * W
    itemsize = jnp.dtype(x.dtype).itemsize
    x3 = x.reshape(N, C, HW)                 # free reshape; no transpose
    w3 = weight.reshape(1, C, 1).astype(jnp.float32)
    b3 = bias.reshape(1, C, 1).astype(jnp.float32)

    # Fused single-pass path when x (plus f32 temps and output) comfortably
    # fits VMEM: ~2x element HBM traffic instead of ~3x.
    fused_vmem_est = x3.size * (4 * itemsize + 8) + 64 * C
    if (not force_two_pass) and fused_vmem_est <= _FUSED_MAX_VMEM:
        y3, mean, var = _fused_forward(x3, w3, b3)
    else:
        y3, mean, var = _two_pass_forward(x3, w3, b3, itemsize, block_bytes)

    y = y3.reshape(N, C, H, W)
    mean4 = mean.reshape(1, C, 1, 1).astype(running_mean.dtype)
    var4 = var.reshape(1, C, 1, 1).astype(running_var.dtype)
    new_running_mean = (1.0 - MOMENTUM) * running_mean + MOMENTUM * mean4
    new_running_var = (1.0 - MOMENTUM) * running_var + MOMENTUM * var4
    return y, new_running_mean, new_running_var


# --------------------------------------------------------------------------
# Reference + tests
# --------------------------------------------------------------------------
def _reference(x, weight, bias, running_mean, running_var):
    mean = jnp.mean(x, axis=(0, 2, 3), keepdims=True)
    var = jnp.mean((x - mean) ** 2, axis=(0, 2, 3), keepdims=True)
    y = weight * (x - mean) / jnp.sqrt(var + EPS) + bias
    new_rm = (1.0 - MOMENTUM) * running_mean + MOMENTUM * mean
    new_rv = (1.0 - MOMENTUM) * running_var + MOMENTUM * var
    return y, new_rm, new_rv


def _run_and_check(x, tag, **kwargs):
    C = x.shape[1]
    # Parameter init matching the torch module: weight=ones, bias=zeros,
    # running-stat buffers = zeros.
    weight = jnp.ones((1, C, 1, 1), jnp.float32)
    bias = jnp.zeros((1, C, 1, 1), jnp.float32)
    rm = jnp.zeros((1, C, 1, 1), jnp.float32)
    rv = jnp.zeros((1, C, 1, 1), jnp.float32)

    y, new_rm, new_rv = batchnorm2d_forward(x, weight, bias, rm, rv, **kwargs)
    jax.block_until_ready((y, new_rm, new_rv))

    y_ref, rm_ref, rv_ref = _reference(x, weight, bias, rm, rv)
    assert y.shape == x.shape, f"{tag}: shape mismatch"
    assert jnp.allclose(y, y_ref, atol=1e-4, rtol=1e-4), f"{tag}: output mismatch"
    assert jnp.allclose(new_rm, rm_ref, atol=1e-5, rtol=1e-5), f"{tag}: running_mean mismatch"
    assert jnp.allclose(new_rv, rv_ref, atol=1e-5, rtol=1e-5), f"{tag}: running_var mismatch"


if __name__ == "__main__":
    key = jax.random.PRNGKey(0)
    k1, k2, k3, k4 = jax.random.split(key, 4)

    # Primary shape from the module spec; default dispatch -> fused single-pass.
    x0 = jax.random.normal(k1, (2, 4, 16, 16), dtype=jnp.float32)
    _run_and_check(x0, "fused")

    # Two-pass tiled path (forced) on the same shape (exercises Nb>1 batching).
    _run_and_check(x0, "two-pass", force_two_pass=True)

    # Multi-step grid: HW-axis accumulation + per-batch partials + chunked
    # lane-wide accumulation (tiny block budget just to exercise the tiling).
    x1 = jax.random.normal(k2, (2, 8, 16, 32), dtype=jnp.float32)
    _run_and_check(x1, "two-pass/tiled-hw", force_two_pass=True, block_bytes=8192)

    # Channel-tiled grid (Cb < C).
    x2 = jax.random.normal(k3, (2, 16, 16, 16), dtype=jnp.float32)
    _run_and_check(x2, "two-pass/tiled-c", force_two_pass=True, block_bytes=4096)

    # Unaligned spatial extent (H*W % 128 != 0) fall-through.
    x3 = jax.random.normal(k4, (2, 4, 10, 10), dtype=jnp.float32)
    _run_and_check(x3, "two-pass/unaligned", force_two_pass=True)

    print("KERNEL_OK")
</pallas_src>

<mosaic_0001>
module attributes {stable_mosaic.version = 11 : i64} {
  func.func @_fused_kernel(%arg0: i32, %arg1: memref<2x4x256xf32, #tpu.memory_space<vmem>>, %arg2: memref<1x4x1xf32, #tpu.memory_space<vmem>>, %arg3: memref<1x4x1xf32, #tpu.memory_space<vmem>>, %arg4: memref<2x4x256xf32, #tpu.memory_space<vmem>>, %arg5: memref<1x4x1xf32, #tpu.memory_space<vmem>>, %arg6: memref<1x4x1xf32, #tpu.memory_space<vmem>>) attributes {dimension_semantics = [#tpu.dimension_semantics<arbitrary>], iteration_bounds = array<i64: 1>, scalar_prefetch = 0 : i64, scratch_operands = 0 : i64, tpu.core_type = #tpu.core_type<tc>, window_params = [{pipeline_mode = #tpu.pipeline_mode<synchronous>, transform_indices = @transform_0, window_bounds = array<i64: 2, 4, 256>}, {pipeline_mode = #tpu.pipeline_mode<synchronous>, transform_indices = @transform_1, window_bounds = array<i64: 1, 4, 1>}, {pipeline_mode = #tpu.pipeline_mode<synchronous>, transform_indices = @transform_2, window_bounds = array<i64: 1, 4, 1>}, {pipeline_mode = #tpu.pipeline_mode<synchronous>, transform_indices = @transform_3, window_bounds = array<i64: 2, 4, 256>}, {pipeline_mode = #tpu.pipeline_mode<synchronous>, transform_indices = @transform_4, window_bounds = array<i64: 1, 4, 1>}, {pipeline_mode = #tpu.pipeline_mode<synchronous>, transform_indices = @transform_5, window_bounds = array<i64: 1, 4, 1>}]} {
    %c0 = arith.constant 0 : index
    %c0_0 = arith.constant 0 : index
    %c0_1 = arith.constant 0 : index
    %0 = vector.load %arg1[%c0, %c0_0, %c0_1] : memref<2x4x256xf32, #tpu.memory_space<vmem>>, vector<2x4x256xf32>
    %cst = arith.constant dense<0.000000e+00> : vector<2x4xf32>
    %1 = vector.multi_reduction <add>, %0, %cst [2] : vector<2x4x256xf32> to vector<2x4xf32>
    %2 = vector.shape_cast %1 : vector<2x4xf32> to vector<2x4x1xf32>
    %3 = arith.mulf %0, %0 : vector<2x4x256xf32>
    %cst_2 = arith.constant dense<0.000000e+00> : vector<2x4xf32>
    %4 = vector.multi_reduction <add>, %3, %cst_2 [2] : vector<2x4x256xf32> to vector<2x4xf32>
    %5 = vector.shape_cast %4 : vector<2x4xf32> to vector<2x4x1xf32>
    %cst_3 = arith.constant dense<0.000000e+00> : vector<4x1xf32>
    %6 = vector.multi_reduction <add>, %2, %cst_3 [0] : vector<2x4x1xf32> to vector<4x1xf32>
    %7 = vector.shape_cast %6 : vector<4x1xf32> to vector<1x4x1xf32>
    %cst_4 = arith.constant dense<0.000000e+00> : vector<4x1xf32>
    %8 = vector.multi_reduction <add>, %5, %cst_4 [0] : vector<2x4x1xf32> to vector<4x1xf32>
    %9 = vector.shape_cast %8 : vector<4x1xf32> to vector<1x4x1xf32>
    %cst_5 = arith.constant 0.001953125 : f32
    %10 = vector.broadcast %cst_5 : f32 to vector<1x4x1xf32>
    %11 = arith.mulf %7, %10 : vector<1x4x1xf32>
    %cst_6 = arith.constant 0.001953125 : f32
    %12 = vector.broadcast %cst_6 : f32 to vector<1x4x1xf32>
    %13 = arith.mulf %9, %12 : vector<1x4x1xf32>
    %14 = arith.mulf %11, %11 : vector<1x4x1xf32>
    %15 = arith.subf %13, %14 : vector<1x4x1xf32>
    %cst_7 = arith.constant 0.000000e+00 : f32
    %16 = vector.broadcast %cst_7 : f32 to vector<1x4x1xf32>
    %17 = arith.maximumf %15, %16 : vector<1x4x1xf32>
    %c0_8 = arith.constant 0 : index
    %c0_9 = arith.constant 0 : index
    %c0_10 = arith.constant 0 : index
    %18 = vector.load %arg2[%c0_8, %c0_9, %c0_10] : memref<1x4x1xf32, #tpu.memory_space<vmem>>, vector<1x4x1xf32>
    %cst_11 = arith.constant 9.99999974E-6 : f32
    %19 = vector.broadcast %cst_11 : f32 to vector<1x4x1xf32>
    %20 = arith.addf %17, %19 : vector<1x4x1xf32>
    %21 = math.rsqrt %20 : vector<1x4x1xf32>
    %22 = arith.mulf %18, %21 : vector<1x4x1xf32>
    %c0_12 = arith.constant 0 : index
    %c0_13 = arith.constant 0 : index
    %c0_14 = arith.constant 0 : index
    %23 = vector.load %arg3[%c0_12, %c0_13, %c0_14] : memref<1x4x1xf32, #tpu.memory_space<vmem>>, vector<1x4x1xf32>
    %24 = arith.mulf %11, %22 : vector<1x4x1xf32>
    %25 = arith.subf %23, %24 : vector<1x4x1xf32>
    %26 = vector.broadcast %22 : vector<1x4x1xf32> to vector<2x4x256xf32>
    %27 = arith.mulf %0, %26 : vector<2x4x256xf32>
    %28 = vector.broadcast %25 : vector<1x4x1xf32> to vector<2x4x256xf32>
    %29 = arith.addf %27, %28 : vector<2x4x256xf32>
    %c0_15 = arith.constant 0 : index
    %c0_16 = arith.constant 0 : index
    %c0_17 = arith.constant 0 : index
    %30 = vector.load %arg4[%c0_15, %c0_16, %c0_17] : memref<2x4x256xf32, #tpu.memory_space<vmem>>, vector<2x4x256xf32>
    tpu.vector_store %arg4[%c0_15, %c0_16, %c0_17], %29 {strides = array<i32>} : memref<2x4x256xf32, #tpu.memory_space<vmem>>, vector<2x4x256xf32>,
    %c0_18 = arith.constant 0 : index
    %c0_19 = arith.constant 0 : index
    %c0_20 = arith.constant 0 : index
    %31 = vector.load %arg5[%c0_18, %c0_19, %c0_20] : memref<1x4x1xf32, #tpu.memory_space<vmem>>, vector<1x4x1xf32>
    tpu.vector_store %arg5[%c0_18, %c0_19, %c0_20], %11 {strides = array<i32>} : memref<1x4x1xf32, #tpu.memory_space<vmem>>, vector<1x4x1xf32>,
    %c0_21 = arith.constant 0 : index
    %c0_22 = arith.constant 0 : index
    %c0_23 = arith.constant 0 : index
    %32 = vector.load %arg6[%c0_21, %c0_22, %c0_23] : memref<1x4x1xf32, #tpu.memory_space<vmem>>, vector<1x4x1xf32>
    tpu.vector_store %arg6[%c0_21, %c0_22, %c0_23], %17 {strides = array<i32>} : memref<1x4x1xf32, #tpu.memory_space<vmem>>, vector<1x4x1xf32>,
    return
  }
  func.func @transform_0(%arg0: i32) -> (i32, i32, i32) {
    %c0_i32 = arith.constant 0 : i32
    %c0_i32_0 = arith.constant 0 : i32
    %c0_i32_1 = arith.constant 0 : i32
    %c0_i32_2 = arith.constant 0 : i32
    return %c0_i32, %c0_i32_0, %c0_i32_1 : i32, i32, i32
  }
  func.func @transform_1(%arg0: i32) -> (i32, i32, i32) {
    %c0_i32 = arith.constant 0 : i32
    %c0_i32_0 = arith.constant 0 : i32
    %c0_i32_1 = arith.constant 0 : i32
    %c0_i32_2 = arith.constant 0 : i32
    return %c0_i32, %c0_i32_0, %c0_i32_1 : i32, i32, i32
  }
  func.func @transform_2(%arg0: i32) -> (i32, i32, i32) {
    %c0_i32 = arith.constant 0 : i32
    %c0_i32_0 = arith.constant 0 : i32
    %c0_i32_1 = arith.constant 0 : i32
    %c0_i32_2 = arith.constant 0 : i32
    return %c0_i32, %c0_i32_0, %c0_i32_1 : i32, i32, i32
  }
  func.func @transform_3(%arg0: i32) -> (i32, i32, i32) {
    %c0_i32 = arith.constant 0 : i32
    %c0_i32_0 = arith.constant 0 : i32
    %c0_i32_1 = arith.constant 0 : i32
    %c0_i32_2 = arith.constant 0 : i32
    return %c0_i32, %c0_i32_0, %c0_i32_1 : i32, i32, i32
  }
  func.func @transform_4(%arg0: i32) -> (i32, i32, i32) {
    %c0_i32 = arith.constant 0 : i32
    %c0_i32_0 = arith.constant 0 : i32
    %c0_i32_1 = arith.constant 0 : i32
    %c0_i32_2 = arith.constant 0 : i32
    return %c0_i32, %c0_i32_0, %c0_i32_1 : i32, i32, i32
  }
  func.func @transform_5(%arg0: i32) -> (i32, i32, i32) {
    %c0_i32 = arith.constant 0 : i32
    %c0_i32_0 = arith.constant 0 : i32
    %c0_i32_1 = arith.constant 0 : i32
    %c0_i32_2 = arith.constant 0 : i32
    return %c0_i32, %c0_i32_0, %c0_i32_1 : i32, i32, i32
  }
}

</mosaic_0001>

<bundles_post_ra>
// kernel: tpu_custom_call.1
= control target key start
LH: loop header
LB: loop body
LE: loop exit
PB: predicated region body
PF: predicated region fallthrough
CT: control target
= control target key end

     0   :  { %11 = vsyncpa [#allocation3], 0  ;;  %s311_s0 = inlined_call_operand.hbm [shape: f32[2,4,256], index: 0, kind: input, shape index: {}]   ;;  %s312_s1 = inlined_call_operand.vmem [shape: f32[1,4,1], index: 1, kind: input, shape index: {}]   ;;  %s313_s2 = inlined_call_operand.vmem [shape: f32[1,4,1], index: 2, kind: input, shape index: {}]   ;;  %s314_s3 = inlined_call_operand.hbm [shape: f32[2,4,256], index: 3, kind: output, shape index: {0}]   ;;  %s315_s4 = inlined_call_operand.vmem [shape: f32[1,4,1], index: 4, kind: output, shape index: {1}]   ;;  %s316_s5 = inlined_call_operand.vmem [shape: f32[1,4,1], index: 5, kind: output, shape index: {2}]  }
   0x1   :  { %12 = vsyncpa [#allocation4], 0  ;;  %s205_s18 = smov [#allocation2]   ;;  %s157_s22 = scalar_lea.hbm %s311_s0, 256 }
   0x2   :  { %s18_s19 = sshll.u32 %s205_s18, 4  ;;  %p158_p0 = scmp.ne.s32.totalorder %s311_s0, %s157_s22  ;;  %s19_s19 = int_to_ptr.vmem [resolvable:$true] %s18_s19 }
   0x3   :  { %p161_p1 = scmp.lt.u32.totalorder %s157_s22, %s311_s0 }
   0x5   :  { %p163_p2 = pnand %p161_p1, %p158_p0 }
   0x7   :  { %166 = shalt.err (!%p163_p2)
}
   0x8   :  { %s167_s27 = scalar_lea.vmem %s19_s19, 256  ;;  %p172_p4 = scmp.lt.s32.totalorder %s19_s19, %s19_s19 }
   0x9   :  { %p168_p3 = scmp.ne.s32.totalorder %s19_s19, %s167_s27  ;;  %p173_p5 = scmp.lt.s32.totalorder %s167_s27, %s167_s27 }
   0xb   :  { %p174_p6 = por %p173_p5, %p172_p4 }
   0xd   :  { %p175_p7 = pnand %p174_p6, %p168_p3 }
   0xf   :  { %178 = shalt.err (!%p175_p7)
}
  0x10   :  { %s206_s28 = smov 128   ;;  %s207_s29 = smov 8  }
  0x11   :  { %24 = dma.hbm_to_vmem [thread:$0]  %s311_s0, 256, %s19_s19, [#allocation3], %s206_s28, %s206_s28, %s207_s29  }
  0x12   :  { %201 = dma.done.wait [#allocation3], 256  }
  0x13   :  { %202 = vsyncadd [#allocation3], 4294967040  ;;  %vm40_vm0 = vcmask 1043456   ;;  %v256_v0 = vld [vmem:[#allocation2] sm:$0xff]  ;;  %v258_v1 = vld [vmem:[#allocation2 + $0x8] sm:$0xff]  ;;  %v208_v20 = vmov 0   ;;  %v94_v45 = vlaneseq }
  0x14   :  { %v36_v2 = vcombine.high %v256_v0, %v256_v0  ;;  %v41_v3 = vsel %vm40_vm0, %v256_v0, 0.0  ;;  %v51_v4 = vmul.f32 %v256_v0, %v256_v0  ;;  %v37_v5 = vcombine.high %v258_v1, %v258_v1  ;;  %151 = vset.pattern.permute.xlu0 %v208_v20  ;;  %152 = vset.pattern.permute.xlu1 %v208_v20  ;;  %v80_v37 = vld [vmem:[%s312_s1] sm:$0xf]  ;;  %s210_s1 = smov [#allocation5]  }
  0x15   :  { %v46_v6 = vsel %vm40_vm0, %v258_v1, 0.0  ;;  %v52_v7 = vmul.f32 %v258_v1, %v258_v1  ;;  %vm117_vm1 = vcmask 3072   ;;  %v84_v40 = vld [vmem:[%s313_s2] sm:$0xf]  ;;  %v209_v43 = vmov 839922192  }
  0x16   :  { %v42_v8 = vsel %vm40_vm0, %v36_v2, 0.0  ;;  %v55_v9 = vcombine.high %v51_v4, %v51_v4  ;;  %v59_v10 = vsel %vm40_vm0, %v51_v4, 0.0  ;;  %v47_v11 = vsel %vm40_vm0, %v37_v5, 0.0 }
  0x17   :  { %v43_v12 = vadd.f32 %v42_v8, %v41_v3  ;;  %v56_v13 = vcombine.high %v52_v7, %v52_v7  ;;  %v64_v15 = vsel %vm40_vm0, %v52_v7, 0.0  ;;  %v48_v17 = vadd.f32 %v47_v11, %v46_v6 }
  0x18   :  { %v60_v14 = vsel %vm40_vm0, %v55_v9, 0.0  ;;  %v92_v44 = vunpack.c.l.s4 %v209_v43  ;;  %v95_v47 = vshrl.u32 %v94_v45, 7 }
  0x19   :  { %44 = vadd.xlane.f32.xlu0 %v43_v12  ;;  %v61_v16 = vadd.f32 %v60_v14, %v59_v10  ;;  %v65_v18 = vsel %vm40_vm0, %v56_v13, 0.0 }
  0x1a   :  { %v66_v19 = vadd.f32 %v65_v18, %v64_v15  ;;  %v93_v46 = vunpack.c.0.s8 %v92_v44 }
  0x1b   :  { %62 = vadd.xlane.f32.xlu1 %v61_v16 }
  0x1c   :  { %v96_v48 = vsub.s32 %v93_v46, %v95_v47 }
  0x1d   :  { %49 = vadd.xlane.f32.xlu0 %v48_v17 }
  0x1f   :  { %67 = vadd.xlane.f32.xlu1 %v66_v19 }
  0xa6   :  { %v45_v21 = vpop.xlane.xlu0 %44 }
  0xa7   :  { %v69_v24 = vsel %vm40_vm0, %v45_v21, 0.0 }
  0xa8   :  { %v63_v22 = vpop.xlane.xlu1 %62 }
  0xa9   :  { %v72_v28 = vsel %vm40_vm0, %v63_v22, 0.0 }
  0xaa   :  { %v50_v23 = vpop.xlane.xlu0 %49 }
  0xab   :  { %v70_v25 = vsel %vm40_vm0, %v50_v23, 0.0 }
  0xac   :  { %v71_v26 = vadd.f32 %v70_v25, %v69_v24  ;;  %v68_v27 = vpop.xlane.xlu1 %67 }
  0xad   :  { %v73_v29 = vsel %vm40_vm0, %v68_v27, 0.0 }
  0xae   :  { %v75_v30 = vmul.f32 0.001953125, %v71_v26  ;;  %v74_v31 = vadd.f32 %v73_v29, %v72_v28 }
  0xb0   :  { %118 = vst.msk [vmem:[%s315_s4] sm:$0xf] %vm117_vm1, %v75_v30  ;;  %v76_v32 = vmul.f32 0.001953125, %v74_v31  ;;  %v77_v33 = vmul.f32 %v75_v30, %v75_v30  ;;  %s125_s4 = sshll.u32 %s210_s1, 4  ;;  %s126_s4 = int_to_ptr.vmem [resolvable:$true] %s125_s4 }
  0xb1   :  { %s179_s2 = scalar_lea.vmem %s126_s4, 256  ;;  %p184_p9 = scmp.lt.s32.totalorder %s126_s4, %s126_s4 }
  0xb2   :  { %v78_v34 = vsub.f32 %v76_v32, %v77_v33  ;;  %p180_p8 = scmp.ne.s32.totalorder %s126_s4, %s179_s2  ;;  %p185_p10 = scmp.lt.s32.totalorder %s179_s2, %s179_s2 }
  0xb4   :  { %v79_v35 = vmax.f32 %v78_v34, 0.0  ;;  %p186_p11 = por %p185_p10, %p184_p9 }
  0xb6   :  { %v81_v36 = vadd.f32 1e-05, %v79_v35  ;;  %119 = vst.msk [vmem:[%s316_s5] sm:$0xf] %vm117_vm1, %v79_v35  ;;  %p187_p12 = pnand %p186_p11, %p180_p8 }
  0xb8   :  { %155 = vrsqrt.f32 %v81_v36 }
  0xc2   :  { %v156_v38 = vpop.eup %155 }
  0xc3   :  { %v83_v39 = vmul.f32 %v156_v38, %v80_v37 }
  0xc5   :  { %89 = vperm.xlu0 %151, %v83_v39   ;;  %v85_v41 = vmul.f32 %v83_v39, %v75_v30 }
  0xc7   :  { %v86_v42 = vsub.f32 %v84_v40, %v85_v41 }
  0xc9   :  { %103 = vperm.xlu1 %152, %v86_v42  }
 0x144   :  { %v90_v49 = vpop.permute.xlu0 %89 }
 0x145   :  { %v97_v50 = vrot.slane %v90_v49, %v96_v48 }
 0x147   :  { %v99_v52 = vmul.f32 %v97_v50, %v256_v0  ;;  %v100_v53 = vmul.f32 %v97_v50, %v258_v1 }
 0x148   :  { %v104_v51 = vpop.permute.xlu1 %103 }
 0x149   :  { %v111_v54 = vrot.slane %v104_v51, %v96_v48 }
 0x14b   :  { %v113_v55 = vadd.f32 %v111_v54, %v99_v52  ;;  %v114_v56 = vadd.f32 %v111_v54, %v100_v53 }
 0x14d   :  { %115 = vst [vmem:[#allocation5] sm:$0xff] %v113_v55  ;;  %116 = vst [vmem:[#allocation5 + $0x8] sm:$0xff] %v114_v56 }
 0x14e   :  { %190 = shalt.err (!%p187_p12)
}
 0x14f   :  { %s191_s15 = scalar_lea.hbm %s314_s3, 256 }
 0x150   :  { %p192_p13 = scmp.ne.s32.totalorder %s314_s3, %s191_s15  ;;  %p195_p0 = scmp.lt.u32.totalorder %s191_s15, %s314_s3 }
 0x152   :  { %p197_p1 = pnand %p195_p0, %p192_p13 }
 0x154   :  { %200 = shalt.err (!%p197_p1)
}
 0x155   :  { %131 = dma.vmem_to_hbm [thread:$0]  %s126_s4, 256, %s314_s3, [#allocation4], %s206_s28, %s206_s28, %s207_s29  }
 0x156   :  { %203 = dma.done.wait [#allocation4], 256  }
 0x157   :  { %204 = vsyncadd [#allocation4], 4294967040 }
 0x158   :  { %143 = vsyncpa [#allocation3], 1 }
 0x159   :  { %144 = vsyncpa [#allocation4], 1 }

</bundles_post_ra>
